<compile_context>
chip_gen: v6e
topology: v6e:2x2x1
jax: 0.10.0
libtpu: 0.0.40
codegen_flags: <defaults>
</compile_context>

<pallas_src>
import functools
import math

import jax
import jax.numpy as jnp
from jax import lax
from jax.experimental import pallas as pl
from jax.experimental.pallas import tpu as pltpu

NEG = -10000.0
LANE = 128


# ----------------------------- Pallas kernel -----------------------------

def _crf_fwd_kernel(meta_ref, unary_ref, expt_ref, mt_ref, te_ref, len_ref,
                    out_ref, alpha_ref, *, tt, start_idx):
    t_blk = pl.program_id(1)
    n_tblk = pl.num_programs(1)
    TB, Np = alpha_ref.shape

    # ---- init alphas at the start of each batch block's time sweep ----
    @pl.when(t_blk == 0)
    def _():
        col = lax.broadcasted_iota(jnp.int32, (TB, Np), 1)
        alpha_ref[...] = jnp.where(col == start_idx, 0.0, NEG).astype(jnp.float32)

    t0 = t_blk * tt
    max_len = meta_ref[0]           # SMEM scalar: max(lengths)

    # ---- recurrence over the TT timesteps of this block ----
    @pl.when(t0 < max_len)          # skip blocks past the longest sequence
    def _():
        alpha0 = alpha_ref[...]     # [TB, Np]
        expt = expt_ref[...]        # [Np, Np]   exp(trans - rowmax).T, (k, j)
        mt = mt_ref[...]            # [1, Np]    per-destination rowmax(trans)
        lens = len_ref[...]         # [TB, Np]   int32 lengths (lane-broadcast)

        def body(i, alpha):
            u_t = unary_ref[i]                                          # [TB, Np]
            m_a = jnp.max(alpha, axis=1, keepdims=True)                 # [TB, 1]
            p = jnp.exp(alpha - m_a)                                    # [TB, Np]
            s = jnp.dot(p, expt, preferred_element_type=jnp.float32)    # MXU
            # Floor keeps log() finite when every source path is "impossible"
            # (only matters for fully-constrained rows; exp underflow is safe).
            s = jnp.maximum(s, 1e-30)
            new_alpha = u_t + m_a + mt + jnp.log(s)                     # [TB, Np]
            active = (t0 + i) < lens
            return jnp.where(active, new_alpha, alpha)

        alpha_ref[...] = lax.fori_loop(0, tt, body, alpha0, unroll=True)

    # ---- finalize: add transition to EOS, logsumexp over tags ----
    @pl.when(t_blk == n_tblk - 1)
    def _():
        term = alpha_ref[...] + te_ref[...]                             # [TB, Np]
        m2 = jnp.max(term, axis=1, keepdims=True)                       # [TB, 1]
        lse = m2 + jnp.log(jnp.sum(jnp.exp(term - m2), axis=1, keepdims=True))
        out_ref[...] = jnp.broadcast_to(lse, (TB, LANE))                # lane-dense


# ------------------------------- wrapper ---------------------------------

def crf_forward_pallas(unary, transitions, lengths, start_idx, end_idx,
                       constraint=None, *, tt=8):
    """CRF.forward (partition function) on a batch.

    unary:       [T, B, N] float
    transitions: [1, N, N] float (nn.Parameter shape from the module)
    lengths:     [B] int
    returns:     [B] float32
    """
    T, B, N = unary.shape
    trans = transitions[0].astype(jnp.float32)
    if constraint is not None:
        # masked_fill(constraint, -10000.0) from the `transitions` property
        trans = jnp.where(constraint[0] != 0, NEG, trans)

    Np = max(LANE, ((N + LANE - 1) // LANE) * LANE)   # lane-dense tag axis
    Tp = ((T + tt - 1) // tt) * tt                    # time padded to blocks
    Bp = ((B + 7) // 8) * 8                           # sublane-aligned batch
    TB = math.gcd(Bp, 64)                             # batch block (multiple of 8)
    nb, nt = Bp // TB, Tp // tt

    # Pad transitions to [Np, Np]; precompute exp form + row maxes once.
    trans_p = jnp.full((Np, Np), NEG, jnp.float32).at[:N, :N].set(trans)
    m_t = jnp.max(trans_p, axis=1)                    # [Np]
    expt_T = jnp.exp(trans_p - m_t[:, None]).T        # [Np, Np], indexed (k, j)
    mt_row = m_t.reshape(1, Np)
    te_row = trans_p[end_idx, :].reshape(1, Np)       # score(EOS <- k)

    # Pad unary to [Tp, Bp, Np] (padded tags / steps / batch rows are masked).
    unary_p = jnp.full((Tp, Bp, Np), NEG, jnp.float32)
    unary_p = unary_p.at[:T, :B, :N].set(unary.astype(jnp.float32))

    lens_p = jnp.zeros((Bp,), jnp.int32).at[:B].set(lengths.astype(jnp.int32))
    lens_b = jnp.broadcast_to(lens_p[:, None], (Bp, Np))
    meta = jnp.max(lengths.astype(jnp.int32)).reshape(1)   # SMEM scalar prefetch

    out = pl.pallas_call(
        functools.partial(_crf_fwd_kernel, tt=tt, start_idx=start_idx),
        out_shape=jax.ShapeDtypeStruct((Bp, LANE), jnp.float32),
        grid_spec=pltpu.PrefetchScalarGridSpec(
            num_scalar_prefetch=1,
            grid=(nb, nt),
            in_specs=[
                pl.BlockSpec((tt, TB, Np), lambda b, t, m: (t, b, 0)),  # unary
                pl.BlockSpec((Np, Np), lambda b, t, m: (0, 0)),          # exp(trans).T
                pl.BlockSpec((1, Np), lambda b, t, m: (0, 0)),           # rowmax(trans)
                pl.BlockSpec((1, Np), lambda b, t, m: (0, 0)),           # trans[EOS, :]
                pl.BlockSpec((TB, Np), lambda b, t, m: (b, 0)),          # lengths
            ],
            out_specs=pl.BlockSpec((TB, LANE), lambda b, t, m: (b, 0)),
            scratch_shapes=[pltpu.VMEM((TB, Np), jnp.float32)],          # alpha carry
        ),
        compiler_params=pltpu.CompilerParams(
            dimension_semantics=("parallel", "arbitrary")),
    )(meta, unary_p, expt_T, mt_row, te_row, lens_b)
    return out[:B, 0]


# --------------------------- pure-JAX reference ---------------------------

def crf_forward_ref(unary, transitions, lengths, start_idx, end_idx):
    T, B, N = unary.shape
    trans = transitions[0]
    alphas = jnp.full((B, N), NEG, jnp.float32).at[:, start_idx].set(0.0)

    def step(alphas, inp):
        t, u_t = inp
        scores = alphas[:, None, :] + trans[None, :, :] + u_t[:, :, None]
        m = jnp.max(scores, axis=2, keepdims=True)
        new_a = (m + jnp.log(jnp.sum(jnp.exp(scores - m), axis=2,
                                     keepdims=True)))[:, :, 0]
        active = (t < lengths)[:, None]
        return jnp.where(active, new_a, alphas), None

    alphas, _ = lax.scan(step, alphas, (jnp.arange(T), unary))
    term = alphas + trans[end_idx][None, :]
    m = jnp.max(term, axis=1, keepdims=True)
    return m[:, 0] + jnp.log(jnp.sum(jnp.exp(term - m), axis=1))


# TODO(synk): viterbi decode / score_sentence involve data-dependent gathers &
# backpointer traversal; only the forward (partition) hot path is kernelized.

# --------------------------------- main -----------------------------------

if __name__ == "__main__":
    T, B, N = 8, 2, 8          # seq, batch, n_tags
    START_IDX, END_IDX = 1, 2  # Offsets.GO, Offsets.EOS

    key = jax.random.PRNGKey(0)
    k_u, k_t = jax.random.split(key)
    unary = jax.random.normal(k_u, (T, B, N), dtype=jnp.float32)
    # nn.Parameter(torch.Tensor(1, N, N).zero_()) -> deterministic init;
    # use a small deterministic perturbation so the kernel path is nontrivial.
    transitions = 0.1 * jax.random.normal(k_t, (1, N, N), dtype=jnp.float32)
    lengths = jnp.array([8, 5], dtype=jnp.int32)

    out = crf_forward_pallas(unary, transitions, lengths, START_IDX, END_IDX)
    out = jax.block_until_ready(out)

    ref = crf_forward_ref(unary, transitions, lengths, START_IDX, END_IDX)
    ref = jax.block_until_ready(ref)

    assert out.shape == (B,)
    assert jnp.allclose(out, ref, rtol=1e-5, atol=1e-3), (out, ref)
    print("KERNEL_OK")
</pallas_src>

<mosaic_0001>
module attributes {stable_mosaic.version = 11 : i64} {
  func.func @_crf_fwd_kernel(%arg0: i32, %arg1: i32, %arg2: memref<1xi32, #tpu.memory_space<smem>>, %arg3: memref<8x8x128xf32, #tpu.memory_space<vmem>>, %arg4: memref<128x128xf32, #tpu.memory_space<vmem>>, %arg5: memref<1x128xf32, #tpu.memory_space<vmem>>, %arg6: memref<1x128xf32, #tpu.memory_space<vmem>>, %arg7: memref<8x128xi32, #tpu.memory_space<vmem>>, %arg8: memref<8x128xf32, #tpu.memory_space<vmem>>, %arg9: memref<8x128xf32, #tpu.memory_space<vmem>>) attributes {dimension_semantics = [#tpu.dimension_semantics<parallel>, #tpu.dimension_semantics<arbitrary>], iteration_bounds = array<i64: 1, 1>, scalar_prefetch = 1 : i64, scratch_operands = 1 : i64, tpu.core_type = #tpu.core_type<tc>, window_params = [{transform_indices = @transform_0, window_bounds = array<i64: 8, 8, 128>}, {pipeline_mode = #tpu.pipeline_mode<synchronous>, transform_indices = @transform_1, window_bounds = array<i64: 128, 128>}, {pipeline_mode = #tpu.pipeline_mode<synchronous>, transform_indices = @transform_2, window_bounds = array<i64: 1, 128>}, {pipeline_mode = #tpu.pipeline_mode<synchronous>, transform_indices = @transform_3, window_bounds = array<i64: 1, 128>}, {transform_indices = @transform_4, window_bounds = array<i64: 8, 128>}, {transform_indices = @transform_5, window_bounds = array<i64: 8, 128>}]} {
    %c0_i32 = arith.constant 0 : i32
    %0 = arith.cmpi eq, %arg1, %c0_i32 : i32
    %1 = arith.extui %0 : i1 to i32
    %c0_i32_0 = arith.constant 0 : i32
    %2 = arith.cmpi ne, %1, %c0_i32_0 : i32
    scf.if %2 {
      %11 = tpu.iota {dimensions = array<i32: 1>} : vector<8x128xi32>
      %c1_i32 = arith.constant 1 : i32
      %12 = vector.broadcast %c1_i32 : i32 to vector<8x128xi32>
      %13 = arith.cmpi eq, %11, %12 : vector<8x128xi32>
      %cst = arith.constant 0.000000e+00 : f32
      %cst_4 = arith.constant -1.000000e+04 : f32
      %14 = vector.broadcast %cst : f32 to vector<8x128xf32>
      %15 = vector.broadcast %cst_4 : f32 to vector<8x128xf32>
      %16 = arith.select %13, %14, %15 : vector<8x128xi1>, vector<8x128xf32>
      %c0_5 = arith.constant 0 : index
      %c0_6 = arith.constant 0 : index
      %17 = vector.load %arg9[%c0_5, %c0_6] : memref<8x128xf32, #tpu.memory_space<vmem>>, vector<8x128xf32>
      tpu.vector_store %arg9[%c0_5, %c0_6], %16 {strides = array<i32>} : memref<8x128xf32, #tpu.memory_space<vmem>>, vector<8x128xf32>,
    } else {
    }
    %c8_i32 = arith.constant 8 : i32
    %3 = arith.muli %arg1, %c8_i32 : i32
    %c0 = arith.constant 0 : index
    %4 = memref.load %arg2[%c0] : memref<1xi32, #tpu.memory_space<smem>>
    %5 = arith.cmpi slt, %3, %4 : i32
    %6 = arith.extui %5 : i1 to i32
    %c0_i32_1 = arith.constant 0 : i32
    %7 = arith.cmpi ne, %6, %c0_i32_1 : i32
    scf.if %7 {
      %c0_4 = arith.constant 0 : index
      %c0_5 = arith.constant 0 : index
      %11 = vector.load %arg9[%c0_4, %c0_5] : memref<8x128xf32, #tpu.memory_space<vmem>>, vector<8x128xf32>
      %c0_6 = arith.constant 0 : index
      %c0_7 = arith.constant 0 : index
      %12 = vector.load %arg4[%c0_6, %c0_7] : memref<128x128xf32, #tpu.memory_space<vmem>>, vector<128x128xf32>
      %c0_8 = arith.constant 0 : index
      %c0_9 = arith.constant 0 : index
      %13 = vector.load %arg5[%c0_8, %c0_9] : memref<1x128xf32, #tpu.memory_space<vmem>>, vector<1x128xf32>
      %c0_10 = arith.constant 0 : index
      %c0_11 = arith.constant 0 : index
      %14 = vector.load %arg7[%c0_10, %c0_11] : memref<8x128xi32, #tpu.memory_space<vmem>>, vector<8x128xi32>
      %c0_i32_12 = arith.constant 0 : i32
      %15 = arith.index_cast %c0_i32_12 : i32 to index
      %c0_13 = arith.constant 0 : index
      %c0_14 = arith.constant 0 : index
      %16 = vector.load %arg3[%15, %c0_13, %c0_14] : memref<8x8x128xf32, #tpu.memory_space<vmem>>, vector<1x8x128xf32>
      %17 = vector.shape_cast %16 : vector<1x8x128xf32> to vector<8x128xf32>
      %cst = arith.constant dense<0xFF800000> : vector<8xf32>
      %18 = vector.multi_reduction <maximumf>, %11, %cst [1] : vector<8x128xf32> to vector<8xf32>
      %19 = vector.shape_cast %18 : vector<8xf32> to vector<8x1xf32>
      %20 = vector.broadcast %19 : vector<8x1xf32> to vector<8x128xf32>
      %21 = arith.subf %11, %20 : vector<8x128xf32>
      %22 = math.exp %21 : vector<8x128xf32>
      %cst_15 = arith.constant dense<0.000000e+00> : vector<8x128xf32>
      %23 = tpu.matmul %22, %12, %cst_15 {dimension_numbers = #tpu.dot_dimension_numbers<[1], [0], [0], [1], [0, 0, 1, 1], [], []>} : vector<8x128xf32>, vector<128x128xf32>, vector<8x128xf32> -> vector<8x128xf32>
      %cst_16 = arith.constant 1.000000e-30 : f32
      %24 = vector.broadcast %cst_16 : f32 to vector<8x128xf32>
      %25 = arith.maximumf %23, %24 : vector<8x128xf32>
      %26 = vector.broadcast %19 : vector<8x1xf32> to vector<8x128xf32>
      %27 = arith.addf %17, %26 : vector<8x128xf32>
      %28 = vector.broadcast %13 : vector<1x128xf32> to vector<8x128xf32>
      %29 = arith.addf %27, %28 : vector<8x128xf32>
      %30 = math.log %25 : vector<8x128xf32>
      %31 = arith.addf %29, %30 : vector<8x128xf32>
      %32 = arith.addi %3, %c0_i32_12 : i32
      %33 = vector.broadcast %32 : i32 to vector<8x128xi32>
      %34 = arith.cmpi slt, %33, %14 : vector<8x128xi32>
      %35 = arith.select %34, %31, %11 : vector<8x128xi1>, vector<8x128xf32>
      %c1_i32 = arith.constant 1 : i32
      %36 = arith.index_cast %c1_i32 : i32 to index
      %c0_17 = arith.constant 0 : index
      %c0_18 = arith.constant 0 : index
      %37 = vector.load %arg3[%36, %c0_17, %c0_18] : memref<8x8x128xf32, #tpu.memory_space<vmem>>, vector<1x8x128xf32>
      %38 = vector.shape_cast %37 : vector<1x8x128xf32> to vector<8x128xf32>
      %cst_19 = arith.constant dense<0xFF800000> : vector<8xf32>
      %39 = vector.multi_reduction <maximumf>, %35, %cst_19 [1] : vector<8x128xf32> to vector<8xf32>
      %40 = vector.shape_cast %39 : vector<8xf32> to vector<8x1xf32>
      %41 = vector.broadcast %40 : vector<8x1xf32> to vector<8x128xf32>
      %42 = arith.subf %35, %41 : vector<8x128xf32>
      %43 = math.exp %42 : vector<8x128xf32>
      %cst_20 = arith.constant dense<0.000000e+00> : vector<8x128xf32>
      %44 = tpu.matmul %43, %12, %cst_20 {dimension_numbers = #tpu.dot_dimension_numbers<[1], [0], [0], [1], [0, 0, 1, 1], [], []>} : vector<8x128xf32>, vector<128x128xf32>, vector<8x128xf32> -> vector<8x128xf32>
      %cst_21 = arith.constant 1.000000e-30 : f32
      %45 = vector.broadcast %cst_21 : f32 to vector<8x128xf32>
      %46 = arith.maximumf %44, %45 : vector<8x128xf32>
      %47 = vector.broadcast %40 : vector<8x1xf32> to vector<8x128xf32>
      %48 = arith.addf %38, %47 : vector<8x128xf32>
      %49 = vector.broadcast %13 : vector<1x128xf32> to vector<8x128xf32>
      %50 = arith.addf %48, %49 : vector<8x128xf32>
      %51 = math.log %46 : vector<8x128xf32>
      %52 = arith.addf %50, %51 : vector<8x128xf32>
      %53 = arith.addi %3, %c1_i32 : i32
      %54 = vector.broadcast %53 : i32 to vector<8x128xi32>
      %55 = arith.cmpi slt, %54, %14 : vector<8x128xi32>
      %56 = arith.select %55, %52, %35 : vector<8x128xi1>, vector<8x128xf32>
      %c2_i32 = arith.constant 2 : i32
      %57 = arith.index_cast %c2_i32 : i32 to index
      %c0_22 = arith.constant 0 : index
      %c0_23 = arith.constant 0 : index
      %58 = vector.load %arg3[%57, %c0_22, %c0_23] : memref<8x8x128xf32, #tpu.memory_space<vmem>>, vector<1x8x128xf32>
      %59 = vector.shape_cast %58 : vector<1x8x128xf32> to vector<8x128xf32>
      %cst_24 = arith.constant dense<0xFF800000> : vector<8xf32>
      %60 = vector.multi_reduction <maximumf>, %56, %cst_24 [1] : vector<8x128xf32> to vector<8xf32>
      %61 = vector.shape_cast %60 : vector<8xf32> to vector<8x1xf32>
      %62 = vector.broadcast %61 : vector<8x1xf32> to vector<8x128xf32>
      %63 = arith.subf %56, %62 : vector<8x128xf32>
      %64 = math.exp %63 : vector<8x128xf32>
      %cst_25 = arith.constant dense<0.000000e+00> : vector<8x128xf32>
      %65 = tpu.matmul %64, %12, %cst_25 {dimension_numbers = #tpu.dot_dimension_numbers<[1], [0], [0], [1], [0, 0, 1, 1], [], []>} : vector<8x128xf32>, vector<128x128xf32>, vector<8x128xf32> -> vector<8x128xf32>
      %cst_26 = arith.constant 1.000000e-30 : f32
      %66 = vector.broadcast %cst_26 : f32 to vector<8x128xf32>
      %67 = arith.maximumf %65, %66 : vector<8x128xf32>
      %68 = vector.broadcast %61 : vector<8x1xf32> to vector<8x128xf32>
      %69 = arith.addf %59, %68 : vector<8x128xf32>
      %70 = vector.broadcast %13 : vector<1x128xf32> to vector<8x128xf32>
      %71 = arith.addf %69, %70 : vector<8x128xf32>
      %72 = math.log %67 : vector<8x128xf32>
      %73 = arith.addf %71, %72 : vector<8x128xf32>
      %74 = arith.addi %3, %c2_i32 : i32
      %75 = vector.broadcast %74 : i32 to vector<8x128xi32>
      %76 = arith.cmpi slt, %75, %14 : vector<8x128xi32>
      %77 = arith.select %76, %73, %56 : vector<8x128xi1>, vector<8x128xf32>
      %c3_i32 = arith.constant 3 : i32
      %78 = arith.index_cast %c3_i32 : i32 to index
      %c0_27 = arith.constant 0 : index
      %c0_28 = arith.constant 0 : index
      %79 = vector.load %arg3[%78, %c0_27, %c0_28] : memref<8x8x128xf32, #tpu.memory_space<vmem>>, vector<1x8x128xf32>
      %80 = vector.shape_cast %79 : vector<1x8x128xf32> to vector<8x128xf32>
      %cst_29 = arith.constant dense<0xFF800000> : vector<8xf32>
      %81 = vector.multi_reduction <maximumf>, %77, %cst_29 [1] : vector<8x128xf32> to vector<8xf32>
      %82 = vector.shape_cast %81 : vector<8xf32> to vector<8x1xf32>
      %83 = vector.broadcast %82 : vector<8x1xf32> to vector<8x128xf32>
      %84 = arith.subf %77, %83 : vector<8x128xf32>
      %85 = math.exp %84 : vector<8x128xf32>
      %cst_30 = arith.constant dense<0.000000e+00> : vector<8x128xf32>
      %86 = tpu.matmul %85, %12, %cst_30 {dimension_numbers = #tpu.dot_dimension_numbers<[1], [0], [0], [1], [0, 0, 1, 1], [], []>} : vector<8x128xf32>, vector<128x128xf32>, vector<8x128xf32> -> vector<8x128xf32>
      %cst_31 = arith.constant 1.000000e-30 : f32
      %87 = vector.broadcast %cst_31 : f32 to vector<8x128xf32>
      %88 = arith.maximumf %86, %87 : vector<8x128xf32>
      %89 = vector.broadcast %82 : vector<8x1xf32> to vector<8x128xf32>
      %90 = arith.addf %80, %89 : vector<8x128xf32>
      %91 = vector.broadcast %13 : vector<1x128xf32> to vector<8x128xf32>
      %92 = arith.addf %90, %91 : vector<8x128xf32>
      %93 = math.log %88 : vector<8x128xf32>
      %94 = arith.addf %92, %93 : vector<8x128xf32>
      %95 = arith.addi %3, %c3_i32 : i32
      %96 = vector.broadcast %95 : i32 to vector<8x128xi32>
      %97 = arith.cmpi slt, %96, %14 : vector<8x128xi32>
      %98 = arith.select %97, %94, %77 : vector<8x128xi1>, vector<8x128xf32>
      %c4_i32 = arith.constant 4 : i32
      %99 = arith.index_cast %c4_i32 : i32 to index
      %c0_32 = arith.constant 0 : index
      %c0_33 = arith.constant 0 : index
      %100 = vector.load %arg3[%99, %c0_32, %c0_33] : memref<8x8x128xf32, #tpu.memory_space<vmem>>, vector<1x8x128xf32>
      %101 = vector.shape_cast %100 : vector<1x8x128xf32> to vector<8x128xf32>
      %cst_34 = arith.constant dense<0xFF800000> : vector<8xf32>
      %102 = vector.multi_reduction <maximumf>, %98, %cst_34 [1] : vector<8x128xf32> to vector<8xf32>
      %103 = vector.shape_cast %102 : vector<8xf32> to vector<8x1xf32>
      %104 = vector.broadcast %103 : vector<8x1xf32> to vector<8x128xf32>
      %105 = arith.subf %98, %104 : vector<8x128xf32>
      %106 = math.exp %105 : vector<8x128xf32>
      %cst_35 = arith.constant dense<0.000000e+00> : vector<8x128xf32>
      %107 = tpu.matmul %106, %12, %cst_35 {dimension_numbers = #tpu.dot_dimension_numbers<[1], [0], [0], [1], [0, 0, 1, 1], [], []>} : vector<8x128xf32>, vector<128x128xf32>, vector<8x128xf32> -> vector<8x128xf32>
      %cst_36 = arith.constant 1.000000e-30 : f32
      %108 = vector.broadcast %cst_36 : f32 to vector<8x128xf32>
      %109 = arith.maximumf %107, %108 : vector<8x128xf32>
      %110 = vector.broadcast %103 : vector<8x1xf32> to vector<8x128xf32>
      %111 = arith.addf %101, %110 : vector<8x128xf32>
      %112 = vector.broadcast %13 : vector<1x128xf32> to vector<8x128xf32>
      %113 = arith.addf %111, %112 : vector<8x128xf32>
      %114 = math.log %109 : vector<8x128xf32>
      %115 = arith.addf %113, %114 : vector<8x128xf32>
      %116 = arith.addi %3, %c4_i32 : i32
      %117 = vector.broadcast %116 : i32 to vector<8x128xi32>
      %118 = arith.cmpi slt, %117, %14 : vector<8x128xi32>
      %119 = arith.select %118, %115, %98 : vector<8x128xi1>, vector<8x128xf32>
      %c5_i32 = arith.constant 5 : i32
      %120 = arith.index_cast %c5_i32 : i32 to index
      %c0_37 = arith.constant 0 : index
      %c0_38 = arith.constant 0 : index
      %121 = vector.load %arg3[%120, %c0_37, %c0_38] : memref<8x8x128xf32, #tpu.memory_space<vmem>>, vector<1x8x128xf32>
      %122 = vector.shape_cast %121 : vector<1x8x128xf32> to vector<8x128xf32>
      %cst_39 = arith.constant dense<0xFF800000> : vector<8xf32>
      %123 = vector.multi_reduction <maximumf>, %119, %cst_39 [1] : vector<8x128xf32> to vector<8xf32>
      %124 = vector.shape_cast %123 : vector<8xf32> to vector<8x1xf32>
      %125 = vector.broadcast %124 : vector<8x1xf32> to vector<8x128xf32>
      %126 = arith.subf %119, %125 : vector<8x128xf32>
      %127 = math.exp %126 : vector<8x128xf32>
      %cst_40 = arith.constant dense<0.000000e+00> : vector<8x128xf32>
      %128 = tpu.matmul %127, %12, %cst_40 {dimension_numbers = #tpu.dot_dimension_numbers<[1], [0], [0], [1], [0, 0, 1, 1], [], []>} : vector<8x128xf32>, vector<128x128xf32>, vector<8x128xf32> -> vector<8x128xf32>
      %cst_41 = arith.constant 1.000000e-30 : f32
      %129 = vector.broadcast %cst_41 : f32 to vector<8x128xf32>
      %130 = arith.maximumf %128, %129 : vector<8x128xf32>
      %131 = vector.broadcast %124 : vector<8x1xf32> to vector<8x128xf32>
      %132 = arith.addf %122, %131 : vector<8x128xf32>
      %133 = vector.broadcast %13 : vector<1x128xf32> to vector<8x128xf32>
      %134 = arith.addf %132, %133 : vector<8x128xf32>
      %135 = math.log %130 : vector<8x128xf32>
      %136 = arith.addf %134, %135 : vector<8x128xf32>
      %137 = arith.addi %3, %c5_i32 : i32
      %138 = vector.broadcast %137 : i32 to vector<8x128xi32>
      %139 = arith.cmpi slt, %138, %14 : vector<8x128xi32>
      %140 = arith.select %139, %136, %119 : vector<8x128xi1>, vector<8x128xf32>
      %c6_i32 = arith.constant 6 : i32
      %141 = arith.index_cast %c6_i32 : i32 to index
      %c0_42 = arith.constant 0 : index
      %c0_43 = arith.constant 0 : index
      %142 = vector.load %arg3[%141, %c0_42, %c0_43] : memref<8x8x128xf32, #tpu.memory_space<vmem>>, vector<1x8x128xf32>
      %143 = vector.shape_cast %142 : vector<1x8x128xf32> to vector<8x128xf32>
      %cst_44 = arith.constant dense<0xFF800000> : vector<8xf32>
      %144 = vector.multi_reduction <maximumf>, %140, %cst_44 [1] : vector<8x128xf32> to vector<8xf32>
      %145 = vector.shape_cast %144 : vector<8xf32> to vector<8x1xf32>
      %146 = vector.broadcast %145 : vector<8x1xf32> to vector<8x128xf32>
      %147 = arith.subf %140, %146 : vector<8x128xf32>
      %148 = math.exp %147 : vector<8x128xf32>
      %cst_45 = arith.constant dense<0.000000e+00> : vector<8x128xf32>
      %149 = tpu.matmul %148, %12, %cst_45 {dimension_numbers = #tpu.dot_dimension_numbers<[1], [0], [0], [1], [0, 0, 1, 1], [], []>} : vector<8x128xf32>, vector<128x128xf32>, vector<8x128xf32> -> vector<8x128xf32>
      %cst_46 = arith.constant 1.000000e-30 : f32
      %150 = vector.broadcast %cst_46 : f32 to vector<8x128xf32>
      %151 = arith.maximumf %149, %150 : vector<8x128xf32>
      %152 = vector.broadcast %145 : vector<8x1xf32> to vector<8x128xf32>
      %153 = arith.addf %143, %152 : vector<8x128xf32>
      %154 = vector.broadcast %13 : vector<1x128xf32> to vector<8x128xf32>
      %155 = arith.addf %153, %154 : vector<8x128xf32>
      %156 = math.log %151 : vector<8x128xf32>
      %157 = arith.addf %155, %156 : vector<8x128xf32>
      %158 = arith.addi %3, %c6_i32 : i32
      %159 = vector.broadcast %158 : i32 to vector<8x128xi32>
      %160 = arith.cmpi slt, %159, %14 : vector<8x128xi32>
      %161 = arith.select %160, %157, %140 : vector<8x128xi1>, vector<8x128xf32>
      %c7_i32 = arith.constant 7 : i32
      %162 = arith.index_cast %c7_i32 : i32 to index
      %c0_47 = arith.constant 0 : index
      %c0_48 = arith.constant 0 : index
      %163 = vector.load %arg3[%162, %c0_47, %c0_48] : memref<8x8x128xf32, #tpu.memory_space<vmem>>, vector<1x8x128xf32>
      %164 = vector.shape_cast %163 : vector<1x8x128xf32> to vector<8x128xf32>
      %cst_49 = arith.constant dense<0xFF800000> : vector<8xf32>
      %165 = vector.multi_reduction <maximumf>, %161, %cst_49 [1] : vector<8x128xf32> to vector<8xf32>
      %166 = vector.shape_cast %165 : vector<8xf32> to vector<8x1xf32>
      %167 = vector.broadcast %166 : vector<8x1xf32> to vector<8x128xf32>
      %168 = arith.subf %161, %167 : vector<8x128xf32>
      %169 = math.exp %168 : vector<8x128xf32>
      %cst_50 = arith.constant dense<0.000000e+00> : vector<8x128xf32>
      %170 = tpu.matmul %169, %12, %cst_50 {dimension_numbers = #tpu.dot_dimension_numbers<[1], [0], [0], [1], [0, 0, 1, 1], [], []>} : vector<8x128xf32>, vector<128x128xf32>, vector<8x128xf32> -> vector<8x128xf32>
      %cst_51 = arith.constant 1.000000e-30 : f32
      %171 = vector.broadcast %cst_51 : f32 to vector<8x128xf32>
      %172 = arith.maximumf %170, %171 : vector<8x128xf32>
      %173 = vector.broadcast %166 : vector<8x1xf32> to vector<8x128xf32>
      %174 = arith.addf %164, %173 : vector<8x128xf32>
      %175 = vector.broadcast %13 : vector<1x128xf32> to vector<8x128xf32>
      %176 = arith.addf %174, %175 : vector<8x128xf32>
      %177 = math.log %172 : vector<8x128xf32>
      %178 = arith.addf %176, %177 : vector<8x128xf32>
      %179 = arith.addi %3, %c7_i32 : i32
      %180 = vector.broadcast %179 : i32 to vector<8x128xi32>
      %181 = arith.cmpi slt, %180, %14 : vector<8x128xi32>
      %182 = arith.select %181, %178, %161 : vector<8x128xi1>, vector<8x128xf32>
      %c8_i32_52 = arith.constant 8 : i32
      %c0_53 = arith.constant 0 : index
      %c0_54 = arith.constant 0 : index
      %183 = vector.load %arg9[%c0_53, %c0_54] : memref<8x128xf32, #tpu.memory_space<vmem>>, vector<8x128xf32>
      tpu.vector_store %arg9[%c0_53, %c0_54], %182 {strides = array<i32>} : memref<8x128xf32, #tpu.memory_space<vmem>>, vector<8x128xf32>,
    } else {
    }
    %c0_i32_2 = arith.constant 0 : i32
    %8 = arith.cmpi eq, %arg1, %c0_i32_2 : i32
    %9 = arith.extui %8 : i1 to i32
    %c0_i32_3 = arith.constant 0 : i32
    %10 = arith.cmpi ne, %9, %c0_i32_3 : i32
    scf.if %10 {
      %c0_4 = arith.constant 0 : index
      %c0_5 = arith.constant 0 : index
      %11 = vector.load %arg9[%c0_4, %c0_5] : memref<8x128xf32, #tpu.memory_space<vmem>>, vector<8x128xf32>
      %c0_6 = arith.constant 0 : index
      %c0_7 = arith.constant 0 : index
      %12 = vector.load %arg6[%c0_6, %c0_7] : memref<1x128xf32, #tpu.memory_space<vmem>>, vector<1x128xf32>
      %13 = vector.broadcast %12 : vector<1x128xf32> to vector<8x128xf32>
      %14 = arith.addf %11, %13 : vector<8x128xf32>
      %cst = arith.constant dense<0xFF800000> : vector<8xf32>
      %15 = vector.multi_reduction <maximumf>, %14, %cst [1] : vector<8x128xf32> to vector<8xf32>
      %16 = vector.shape_cast %15 : vector<8xf32> to vector<8x1xf32>
      %17 = vector.broadcast %16 : vector<8x1xf32> to vector<8x128xf32>
      %18 = arith.subf %14, %17 : vector<8x128xf32>
      %19 = math.exp %18 : vector<8x128xf32>
      %cst_8 = arith.constant dense<0.000000e+00> : vector<8xf32>
      %20 = vector.multi_reduction <add>, %19, %cst_8 [1] : vector<8x128xf32> to vector<8xf32>
      %21 = vector.shape_cast %20 : vector<8xf32> to vector<8x1xf32>
      %22 = math.log %21 : vector<8x1xf32>
      %23 = arith.addf %16, %22 : vector<8x1xf32>
      %24 = vector.shape_cast %23 : vector<8x1xf32> to vector<8x1xf32>
      %25 = vector.broadcast %24 : vector<8x1xf32> to vector<8x128xf32>
      %c0_9 = arith.constant 0 : index
      %c0_10 = arith.constant 0 : index
      %26 = vector.load %arg8[%c0_9, %c0_10] : memref<8x128xf32, #tpu.memory_space<vmem>>, vector<8x128xf32>
      tpu.vector_store %arg8[%c0_9, %c0_10], %25 {strides = array<i32>} : memref<8x128xf32, #tpu.memory_space<vmem>>, vector<8x128xf32>,
    } else {
    }
    return
  }
  func.func @transform_0(%arg0: i32, %arg1: i32, %arg2: memref<1xi32, #tpu.memory_space<smem>>) -> (i32, i32, i32) {
    %c0_i32 = arith.constant 0 : i32
    %c0_i32_0 = arith.constant 0 : i32
    return %arg1, %arg0, %c0_i32 : i32, i32, i32
  }
  func.func @transform_1(%arg0: i32, %arg1: i32, %arg2: memref<1xi32, #tpu.memory_space<smem>>) -> (i32, i32) {
    %c0_i32 = arith.constant 0 : i32
    %c0_i32_0 = arith.constant 0 : i32
    %c0_i32_1 = arith.constant 0 : i32
    return %c0_i32, %c0_i32_0 : i32, i32
  }
  func.func @transform_2(%arg0: i32, %arg1: i32, %arg2: memref<1xi32, #tpu.memory_space<smem>>) -> (i32, i32) {
    %c0_i32 = arith.constant 0 : i32
    %c0_i32_0 = arith.constant 0 : i32
    %c0_i32_1 = arith.constant 0 : i32
    return %c0_i32, %c0_i32_0 : i32, i32
  }
  func.func @transform_3(%arg0: i32, %arg1: i32, %arg2: memref<1xi32, #tpu.memory_space<smem>>) -> (i32, i32) {
    %c0_i32 = arith.constant 0 : i32
    %c0_i32_0 = arith.constant 0 : i32
    %c0_i32_1 = arith.constant 0 : i32
    return %c0_i32, %c0_i32_0 : i32, i32
  }
  func.func @transform_4(%arg0: i32, %arg1: i32, %arg2: memref<1xi32, #tpu.memory_space<smem>>) -> (i32, i32) {
    %c0_i32 = arith.constant 0 : i32
    %c0_i32_0 = arith.constant 0 : i32
    return %arg0, %c0_i32 : i32, i32
  }
  func.func @transform_5(%arg0: i32, %arg1: i32, %arg2: memref<1xi32, #tpu.memory_space<smem>>) -> (i32, i32) {
    %c0_i32 = arith.constant 0 : i32
    %c0_i32_0 = arith.constant 0 : i32
    return %arg0, %c0_i32 : i32, i32
  }
}

</mosaic_0001>

<bundles_post_ra>
// kernel: tpu_custom_call.1
= control target key start
LH: loop header
LB: loop body
LE: loop exit
PB: predicated region body
PF: predicated region fallthrough
CT: control target
= control target key end

     0   :  { %12 = vsyncpa [#allocation6], 0  ;;  %s1789_s0 = inlined_call_operand.<no memory space> [shape: s32[1], index: 0, kind: input, shape index: {}]   ;;  %s1790_s1 = inlined_call_operand.hbm [shape: f32[8,8,128], index: 1, kind: input, shape index: {}]   ;;  %s1791_s2 = inlined_call_operand.hbm [shape: f32[128,128], index: 2, kind: input, shape index: {}]   ;;  %s1792_s3 = inlined_call_operand.vmem [shape: f32[1,128], index: 3, kind: input, shape index: {}]   ;;  %s1793_s4 = inlined_call_operand.hbm [shape: f32[1,128], index: 4, kind: input, shape index: {}]   ;;  %s1794_s5 = inlined_call_operand.vmem [shape: s32[8,128], index: 5, kind: input, shape index: {}]   ;;  %s1795_s6 = inlined_call_operand.hbm [shape: f32[8,128], index: 6, kind: output, shape index: {}]  }
   0x1   :  { %13 = vsyncpa [#allocation9], 0 }
   0x2   :  { %14 = vsyncpa [#allocation7], 0  ;;  %s1395_s21 = smov [#allocation8]   ;;  %s1396_s23 = smov [#allocation5]  }
   0x3   :  { %s32_s22 = sshll.u32 %s1395_s21, 4  ;;  %s20_s24 = sshll.u32 %s1396_s23, 4  ;;  %s33_s22 = int_to_ptr.vmem [resolvable:$true] %s32_s22  ;;  %s21_s24 = int_to_ptr.vmem [resolvable:$true] %s20_s24 }
   0x4   :  { %s1317_s25 = scalar_lea.vmem %s33_s22, 2048  ;;  %p1322_p1 = scmp.lt.s32.totalorder %s33_s22, %s33_s22 }
   0x5   :  { %p1318_p0 = scmp.ne.s32.totalorder %s33_s22, %s1317_s25  ;;  %p1323_p2 = scmp.lt.s32.totalorder %s1317_s25, %s1317_s25 }
   0x7   :  { %p1324_p3 = por %p1323_p2, %p1322_p1 }
   0x9   :  { %p1325_p4 = pnand %p1324_p3, %p1318_p0 }
   0xb   :  { %1328 = shalt.err (!%p1325_p4)
}
   0xc   :  { %s1397_s26 = smov 128   ;;  %s1398_s27 = smov 8  }
   0xd   :  { %38 = dma.hbm_to_vmem [thread:$0]  %s1791_s2, 2048, %s33_s22, [#allocation9], %s1397_s26, %s1397_s26, %s1398_s27  }
   0xe   :  { %s1337_s30 = scalar_lea.vmem %s21_s24, 1024  ;;  %p1342_p6 = scmp.lt.s32.totalorder %s21_s24, %s21_s24 }
   0xf   :  { %p1338_p5 = scmp.ne.s32.totalorder %s21_s24, %s1337_s30  ;;  %p1343_p7 = scmp.lt.s32.totalorder %s1337_s30, %s1337_s30 }
  0x11   :  { %p1344_p8 = por %p1343_p7, %p1342_p6 }
  0x13   :  { %p1345_p9 = pnand %p1344_p8, %p1338_p5 }
  0x15   :  { %1348 = shalt.err (!%p1345_p9)
}
  0x16   :  { %26 = dma.hbm_to_vmem [thread:$0]  %s1790_s1, 1024, %s21_s24, [#allocation6], %s1397_s26, %s1397_s26, %s1398_s27  }
  0x17   :  { %s1399_s9 = smov [#allocation10]  }
  0x18   :  { %s47_s10 = sshll.u32 %s1399_s9, 4  ;;  %s48_s10 = int_to_ptr.vmem [resolvable:$true] %s47_s10 }
  0x19   :  { %s1357_s11 = scalar_lea.vmem %s48_s10, 16  ;;  %s1361_s12 = scalar_lea.vmem %s48_s10, 32 }
  0x1a   :  { %p1358_p10 = scmp.ne.s32.totalorder %s48_s10, %s1357_s11  ;;  %p1362_p11 = scmp.lt.s32.totalorder %s48_s10, %s48_s10 }
  0x1b   :  { %p1363_p12 = scmp.lt.s32.totalorder %s1361_s12, %s1357_s11 }
  0x1d   :  { %p1364_p13 = por %p1363_p12, %p1362_p11 }
  0x1f   :  { %p1365_p0 = pnand %p1364_p13, %p1358_p10 }
  0x21   :  { %1368 = shalt.err (!%p1365_p0)
}
  0x22   :  { %50 = dma.hbm_to_vmem [thread:$0]  %s1793_s4, 16, %s48_s10, [#allocation9]  }
  0x23   :  { %1389 = dma.done.wait [#allocation6], 1024  }
  0x24   :  { %1390 = vsyncadd [#allocation6], 4294966272 }
  0x25   :  { %1391 = dma.done.wait [#allocation9], 2064  }
  0x26   :  { %1392 = vsyncadd [#allocation9], 4294965232  ;;  %v66_v0 = vlaneseq  ;;  %v1400_v2 = vmov -10000.0   ;;  %p837_p1 = scmp.le.s32.totalorder %s1789_s0, 0 }
  0x28   :  { %v67_v1 = vand.u32 127, %v66_v0  ;;  %76 = sbr.rel (%p837_p1) target bundleno = 3013 (0xbc5), region = 41 }
  0x2a   :  { %vm68_vm0 = vcmp.eq.s32.totalorder %v67_v1, 1 }
  0x2b   :  { %v69_v3 = vsel %vm68_vm0, 0.0, %v1400_v2 }
  0x2c   :  { %70 = vst [vmem:[#allocation2] sm:$0xff] %v69_v3 }
  0x2d   :  { %v1453_v5 = vld [vmem:[#allocation8 + $0x78] sm:$0xff]  ;;  %v1401_v6 = vmov 0.0   ;;  %v1457_v7 = vld [vmem:[#allocation8 + $0x70] sm:$0xff]  ;;  %v1462_v8 = vld [vmem:[#allocation8 + $0x68] sm:$0xff]  ;;  %vm1402_vm1 = vmmov 0  }
  0x2e   :  { %984 = vmatprep.subr.mxu0 %v1401_v6  ;;  %1019 = vmatprep.subr.mxu1 %v1401_v6  ;;  %v1468_v9 = vld [vmem:[#allocation8 + $0x60] sm:$0xff]  ;;  %v1474_v10 = vld [vmem:[#allocation8 + $0x58] sm:$0xff]  ;;  %v1480_v11 = vld [vmem:[#allocation8 + $0x50] sm:$0xff] }
  0x2f   :  { %985 = vmatpush3.msra.mxu0 %v1453_v5  ;;  %1020 = vmatpush3.msra.mxu1 %v1453_v5  ;;  %v1486_v12 = vld [vmem:[#allocation8 + $0x48] sm:$0xff]  ;;  %v1492_v13 = vld [vmem:[#allocation8 + $0x40] sm:$0xff]  ;;  %v1498_v14 = vld [vmem:[#allocation8 + $0x38] sm:$0xff] }
  0x30   :  { %986 = vmatprep.subr.mxu0 %v1401_v6  ;;  %1021 = vmatprep.subr.mxu1 %v1401_v6  ;;  %v1505_v15 = vld [vmem:[#allocation8 + $0x30] sm:$0xff]  ;;  %v1511_v16 = vld [vmem:[#allocation8 + $0x28] sm:$0xff]  ;;  %v1517_v17 = vld [vmem:[#allocation8 + $0x20] sm:$0xff] }
  0x31   :  { %987 = vmatpush3.msra.mxu0 %v1457_v7  ;;  %1022 = vmatpush3.msra.mxu1 %v1457_v7  ;;  %v1523_v18 = vld [vmem:[#allocation8 + $0x18] sm:$0xff]  ;;  %v1529_v19 = vld [vmem:[#allocation8 + $0x10] sm:$0xff]  ;;  %v1535_v20 = vld [vmem:[#allocation8 + $0x8] sm:$0xff] }
  0x32   :  { %988 = vmatprep.subr.mxu0 %v1401_v6  ;;  %1023 = vmatprep.subr.mxu1 %v1401_v6  ;;  %v1541_v21 = vld [vmem:[#allocation8] sm:$0xff]  ;;  %v1594_v31 = vld [vmem:[%s1792_s3] ss:$0 sm:$0xff]  ;;  %v188_v45 = vld [vmem:[#allocation5 + $0x8] sm:$0xff] }
  0x33   :  { %v1451_v4 = vld [vmem:[#allocation2] sm:$0xff]  ;;  %989 = vmatpush3.msra.mxu0 %v1462_v8  ;;  %1024 = vmatpush3.msra.mxu1 %v1462_v8  ;;  %v96_v29 = vld [vmem:[#allocation5] sm:$0xff]  ;;  %v275_v59 = vld [vmem:[#allocation5 + $0x10] sm:$0xff] }
  0x34   :  { %97 = vmax.xlane.f32.xlu0 %v1451_v4  ;;  %990 = vmatprep.subr.mxu0 %v1401_v6  ;;  %v1599_v32 = vld [vmem:[%s1794_s5] sm:$0xff] }
  0x35   :  { %991 = vmatpush3.msra.mxu0 %v1468_v9  ;;  %1025 = vmatprep.subr.mxu1 %v1401_v6  ;;  %vm839_vm2 = vcmp.gt.s32.totalorder %v1599_v32, 0  ;;  %vm840_vm3 = vcmp.gt.s32.totalorder %v1599_v32, 1  ;;  %vm841_vm4 = vcmp.gt.s32.totalorder %v1599_v32, 2  ;;  %vm842_vm5 = vcmp.gt.s32.totalorder %v1599_v32, 3 }
  0x36   :  { %992 = vmatprep.subr.mxu0 %v1401_v6  ;;  %1026 = vmatpush3.msra.mxu1 %v1468_v9  ;;  %vm843_vm6 = vcmp.gt.s32.totalorder %v1599_v32, 4  ;;  %vm844_vm7 = vcmp.gt.s32.totalorder %v1599_v32, 5  ;;  %vm845_vm8 = vcmp.gt.s32.totalorder %v1599_v32, 6  ;;  %vm846_vm9 = vcmp.gt.s32.totalorder %v1599_v32, 7 }
  0x37   :  { %993 = vmatpush3.msra.mxu0 %v1474_v10  ;;  %1027 = vmatprep.subr.mxu1 %v1401_v6 }
  0x38   :  { %994 = vmatprep.subr.mxu0 %v1401_v6  ;;  %1028 = vmatpush3.msra.mxu1 %v1474_v10 }
  0x39   :  { %995 = vmatpush3.msra.mxu0 %v1480_v11  ;;  %1029 = vmatprep.subr.mxu1 %v1401_v6 }
  0x3a   :  { %996 = vmatprep.subr.mxu0 %v1401_v6  ;;  %1030 = vmatpush3.msra.mxu1 %v1480_v11 }
  0x3b   :  { %997 = vmatpush3.msra.mxu0 %v1486_v12  ;;  %1031 = vmatprep.subr.mxu1 %v1401_v6 }
  0x3c   :  { %998 = vmatprep.subr.mxu0 %v1401_v6  ;;  %1032 = vmatpush3.msra.mxu1 %v1486_v12 }
  0x3d   :  { %999 = vmatpush3.msra.mxu0 %v1492_v13  ;;  %1016 = vmatprep.mubr.msk.f32.mxu0 %vm1402_vm1, %v1401_v6 }
  0x3e   :  { %1000 = vmatprep.subr.mxu0 %v1401_v6  ;;  %1033 = vmatprep.subr.mxu1 %v1401_v6 }
  0x3f   :  { %1001 = vmatpush3.msra.mxu0 %v1498_v14  ;;  %1034 = vmatpush3.msra.mxu1 %v1492_v13 }
  0x40   :  { %1002 = vmatprep.subr.mxu0 %v1401_v6  ;;  %1035 = vmatprep.subr.mxu1 %v1401_v6 }
  0x41   :  { %1003 = vmatpush3.msra.mxu0 %v1505_v15  ;;  %1036 = vmatpush3.msra.mxu1 %v1498_v14 }
  0x42   :  { %1004 = vmatprep.subr.mxu0 %v1401_v6  ;;  %1037 = vmatprep.subr.mxu1 %v1401_v6 }
  0x43   :  { %1005 = vmatpush3.msra.mxu0 %v1511_v16  ;;  %1038 = vmatpush3.msra.mxu1 %v1505_v15 }
  0x44   :  { %1006 = vmatprep.subr.mxu0 %v1401_v6  ;;  %1039 = vmatprep.subr.mxu1 %v1401_v6 }
  0x45   :  { %1007 = vmatpush3.msra.mxu0 %v1517_v17  ;;  %1040 = vmatpush3.msra.mxu1 %v1511_v16 }
  0x46   :  { %1008 = vmatprep.subr.mxu0 %v1401_v6  ;;  %1041 = vmatprep.subr.mxu1 %v1401_v6 }
  0x47   :  { %1009 = vmatpush3.msra.mxu0 %v1523_v18  ;;  %1042 = vmatpush3.msra.mxu1 %v1517_v17 }
  0x48   :  { %1010 = vmatprep.subr.mxu0 %v1401_v6  ;;  %1043 = vmatprep.subr.mxu1 %v1401_v6 }
  0x49   :  { %1011 = vmatpush3.msra.mxu0 %v1529_v19  ;;  %1044 = vmatpush3.msra.mxu1 %v1523_v18 }
  0x4a   :  { %1012 = vmatprep.subr.mxu0 %v1401_v6  ;;  %1045 = vmatprep.subr.mxu1 %v1401_v6 }
  0x4b   :  { %1013 = vmatpush3.msra.mxu0 %v1535_v20  ;;  %1046 = vmatpush3.msra.mxu1 %v1529_v19 }
  0x4c   :  { %1014 = vmatprep.subr.mxu0 %v1401_v6  ;;  %1047 = vmatprep.subr.mxu1 %v1401_v6 }
  0x4d   :  { %1015 = vmatpush3.msra.mxu0 %v1541_v21  ;;  %1048 = vmatpush3.msra.mxu1 %v1535_v20 }
  0x4e   :  { %1049 = vmatprep.subr.mxu1 %v1401_v6  ;;  %1051 = vmatprep.mubr.msk.f32.mxu1 %vm1402_vm1, %v1401_v6 }
  0x4f   :  { %1050 = vmatpush3.msra.mxu1 %v1541_v21  ;;  %1054 = vmatprep.subr.mxu0 %v1401_v6 }
  0x50   :  { %1089 = vmatprep.subr.mxu1 %v1401_v6 }
  0xbd   :  { %v98_v22 = vpop.xlane.xlu0 %97 }
  0xbe   :  { %v99_v23 = vsub.f32 %v1451_v4, %v98_v22  ;;  %v173_v30 = vadd.f32 %v98_v22, %v96_v29 }
  0xc0   :  { %v100_v24 = vmul.f32 1.442695, %v99_v23  ;;  %v180_v34 = vadd.f32 %v1594_v31, %v173_v30 }
  0xc2   :  { %1273 = vpow2.f32 %v100_v24 }
  0xcf   :  { %v1274_v25 = vpop.eup %1273 }
  0xd0   :  { %1017 = vmatmul.mubr.f32.vlgmr.msra.gmra.mxu0 %v1274_v25 }
  0xd1   :  { %1055 = vmatpush3.msra.mxu0 %v1453_v5  ;;  %1086 = vmatprep.mubr.msk.f32.mxu0 %vm1402_vm1, %v1401_v6 }
  0xd2   :  { %1056 = vmatprep.subr.mxu0 %v1401_v6 }
  0xd3   :  { %1057 = vmatpush3.msra.mxu0 %v1457_v7 }
  0xd4   :  { %1058 = vmatprep.subr.mxu0 %v1401_v6 }
  0xd5   :  { %1059 = vmatpush3.msra.mxu0 %v1462_v8 }
  0xd6   :  { %1060 = vmatprep.subr.mxu0 %v1401_v6 }
  0xd7   :  { %1061 = vmatpush3.msra.mxu0 %v1468_v9 }
  0xd8   :  { %1062 = vmatprep.subr.mxu0 %v1401_v6 }
  0xd9   :  { %1063 = vmatpush3.msra.mxu0 %v1474_v10 }
  0xda   :  { %1064 = vmatprep.subr.mxu0 %v1401_v6 }
  0xdb   :  { %1065 = vmatpush3.msra.mxu0 %v1480_v11 }
  0xdc   :  { %1066 = vmatprep.subr.mxu0 %v1401_v6 }
  0xdd   :  { %1067 = vmatpush3.msra.mxu0 %v1486_v12 }
  0xde   :  { %1068 = vmatprep.subr.mxu0 %v1401_v6 }
  0xdf   :  { %1069 = vmatpush3.msra.mxu0 %v1492_v13 }
  0xe0   :  { %1070 = vmatprep.subr.mxu0 %v1401_v6 }
  0xe1   :  { %1071 = vmatpush3.msra.mxu0 %v1498_v14 }
  0xe2   :  { %1072 = vmatprep.subr.mxu0 %v1401_v6 }
  0xe3   :  { %1073 = vmatpush3.msra.mxu0 %v1505_v15 }
  0xe4   :  { %1074 = vmatprep.subr.mxu0 %v1401_v6 }
  0xe5   :  { %1075 = vmatpush3.msra.mxu0 %v1511_v16 }
  0xe6   :  { %1076 = vmatprep.subr.mxu0 %v1401_v6 }
  0xe7   :  { %1077 = vmatpush3.msra.mxu0 %v1517_v17 }
  0xe8   :  { %1078 = vmatprep.subr.mxu0 %v1401_v6 }
  0xe9   :  { %1079 = vmatpush3.msra.mxu0 %v1523_v18 }
  0xea   :  { %1080 = vmatprep.subr.mxu0 %v1401_v6 }
  0xeb   :  { %1081 = vmatpush3.msra.mxu0 %v1529_v19 }
  0xec   :  { %1082 = vmatprep.subr.mxu0 %v1401_v6 }
  0xed   :  { %1083 = vmatpush3.msra.mxu0 %v1535_v20 }
  0xee   :  { %1084 = vmatprep.subr.mxu0 %v1401_v6 }
  0xef   :  { %1085 = vmatpush3.msra.mxu0 %v1541_v21 }
  0xf0   :  { %1124 = vmatprep.subr.mxu0 %v1401_v6 }
 0x190   :  { %v168_v26 = vpop.f32.mrf.mxu0 }
 0x191   :  { %v172_v27 = vmax.f32 %v168_v26, 1e-30  ;;  %v362_v26 = vld [vmem:[#allocation5 + $0x18] sm:$0xff] }
 0x192   :  { %v1018_v28 = vpop.f32.mrf.mxu0 }
 0x193   :  { %1275 = vlog2.f32 %v172_v27 }
 0x1a0   :  { %v1276_v33 = vpop.eup %1275 }
 0x1a1   :  { %v182_v35 = vmul.f32 0.6931472, %v1276_v33 }
 0x1a3   :  { %v183_v36 = vadd.f32 %v182_v35, %v180_v34 }
 0x1a5   :  { %v186_v37 = vsel %vm839_vm2, %v183_v36, %v1451_v4 }
 0x1a6   :  { %189 = vmax.xlane.f32.xlu0 %v186_v37 }
 0x22f   :  { %v190_v38 = vpop.xlane.xlu0 %189 }
 0x230   :  { %v191_v39 = vsub.f32 %v186_v37, %v190_v38  ;;  %v265_v46 = vadd.f32 %v190_v38, %v188_v45 }
 0x232   :  { %v192_v40 = vmul.f32 1.442695, %v191_v39  ;;  %v266_v48 = vadd.f32 %v1594_v31, %v265_v46 }
 0x234   :  { %1277 = vpow2.f32 %v192_v40 }
 0x241   :  { %v1278_v41 = vpop.eup %1277 }
 0x242   :  { %1052 = vmatmul.mubr.f32.vlgmr.msra.gmra.mxu1 %v1278_v41 }
 0x243   :  { %1090 = vmatpush3.msra.mxu1 %v1453_v5  ;;  %1121 = vmatprep.mubr.msk.f32.mxu1 %vm1402_vm1, %v1401_v6 }
 0x244   :  { %1091 = vmatprep.subr.mxu1 %v1401_v6 }
 0x245   :  { %1092 = vmatpush3.msra.mxu1 %v1457_v7 }
 0x246   :  { %1093 = vmatprep.subr.mxu1 %v1401_v6 }
 0x247   :  { %1094 = vmatpush3.msra.mxu1 %v1462_v8 }
 0x248   :  { %1095 = vmatprep.subr.mxu1 %v1401_v6 }
 0x249   :  { %1096 = vmatpush3.msra.mxu1 %v1468_v9 }
 0x24a   :  { %1097 = vmatprep.subr.mxu1 %v1401_v6 }
 0x24b   :  { %1098 = vmatpush3.msra.mxu1 %v1474_v10 }
 0x24c   :  { %1099 = vmatprep.subr.mxu1 %v1401_v6 }
 0x24d   :  { %1100 = vmatpush3.msra.mxu1 %v1480_v11 }
 0x24e   :  { %1101 = vmatprep.subr.mxu1 %v1401_v6 }
 0x24f   :  { %1102 = vmatpush3.msra.mxu1 %v1486_v12 }
 0x250   :  { %1103 = vmatprep.subr.mxu1 %v1401_v6 }
 0x251   :  { %1104 = vmatpush3.msra.mxu1 %v1492_v13 }
 0x252   :  { %1105 = vmatprep.subr.mxu1 %v1401_v6 }
 0x253   :  { %1106 = vmatpush3.msra.mxu1 %v1498_v14 }
 0x254   :  { %1107 = vmatprep.subr.mxu1 %v1401_v6 }
 0x255   :  { %1108 = vmatpush3.msra.mxu1 %v1505_v15 }
 0x256   :  { %1109 = vmatprep.subr.mxu1 %v1401_v6 }
 0x257   :  { %1110 = vmatpush3.msra.mxu1 %v1511_v16 }
 0x258   :  { %1111 = vmatprep.subr.mxu1 %v1401_v6 }
 0x259   :  { %1112 = vmatpush3.msra.mxu1 %v1517_v17 }
 0x25a   :  { %1113 = vmatprep.subr.mxu1 %v1401_v6 }
 0x25b   :  { %1114 = vmatpush3.msra.mxu1 %v1523_v18 }
 0x25c   :  { %1115 = vmatprep.subr.mxu1 %v1401_v6 }
 0x25d   :  { %1116 = vmatpush3.msra.mxu1 %v1529_v19 }
 0x25e   :  { %1117 = vmatprep.subr.mxu1 %v1401_v6 }
 0x25f   :  { %1118 = vmatpush3.msra.mxu1 %v1535_v20 }
 0x260   :  { %1119 = vmatprep.subr.mxu1 %v1401_v6 }
 0x261   :  { %1120 = vmatpush3.msra.mxu1 %v1541_v21 }
 0x262   :  { %1159 = vmatprep.subr.mxu1 %v1401_v6 }
 0x302   :  { %v260_v42 = vpop.f32.mrf.mxu1 }
 0x303   :  { %v264_v43 = vmax.f32 %v260_v42, 1e-30  ;;  %v449_v42 = vld [vmem:[#allocation5 + $0x20] sm:$0xff] }
 0x304   :  { %v1053_v44 = vpop.f32.mrf.mxu1 }
 0x305   :  { %1279 = vlog2.f32 %v264_v43 }
 0x312   :  { %v1280_v47 = vpop.eup %1279 }
 0x313   :  { %v268_v49 = vmul.f32 0.6931472, %v1280_v47 }
 0x315   :  { %v269_v50 = vadd.f32 %v268_v49, %v266_v48 }
 0x317   :  { %v273_v51 = vsel %vm840_vm3, %v269_v50, %v186_v37 }
 0x318   :  { %276 = vmax.xlane.f32.xlu1 %v273_v51 }
 0x3a1   :  { %v277_v52 = vpop.xlane.xlu1 %276 }
 0x3a2   :  { %v278_v53 = vsub.f32 %v273_v51, %v277_v52  ;;  %v352_v60 = vadd.f32 %v277_v52, %v275_v59 }
 0x3a4   :  { %v279_v54 = vmul.f32 1.442695, %v278_v53  ;;  %v353_v62 = vadd.f32 %v1594_v31, %v352_v60  ;;  %v623_v53 = vld [vmem:[#allocation5 + $0x30] sm:$0xff] }
 0x3a6   :  { %1281 = vpow2.f32 %v279_v54 }
 0x3b3   :  { %v1282_v55 = vpop.eup %1281 }
 0x3b4   :  { %1087 = vmatmul.mubr.f32.vlgmr.msra.gmra.mxu0 %v1282_v55 }
 0x3b5   :  { %1125 = vmatpush3.msra.mxu0 %v1453_v5  ;;  %1156 = vmatprep.mubr.msk.f32.mxu0 %vm1402_vm1, %v1401_v6 }
 0x3b6   :  { %1126 = vmatprep.subr.mxu0 %v1401_v6 }
 0x3b7   :  { %1127 = vmatpush3.msra.mxu0 %v1457_v7 }
 0x3b8   :  { %1128 = vmatprep.subr.mxu0 %v1401_v6 }
 0x3b9   :  { %1129 = vmatpush3.msra.mxu0 %v1462_v8 }
 0x3ba   :  { %1130 = vmatprep.subr.mxu0 %v1401_v6 }
 0x3bb   :  { %1131 = vmatpush3.msra.mxu0 %v1468_v9 }
 0x3bc   :  { %1132 = vmatprep.subr.mxu0 %v1401_v6 }
 0x3bd   :  { %1133 = vmatpush3.msra.mxu0 %v1474_v10 }
 0x3be   :  { %1134 = vmatprep.subr.mxu0 %v1401_v6 }
 0x3bf   :  { %1135 = vmatpush3.msra.mxu0 %v1480_v11 }
 0x3c0   :  { %1136 = vmatprep.subr.mxu0 %v1401_v6 }
 0x3c1   :  { %1137 = vmatpush3.msra.mxu0 %v1486_v12 }
 0x3c2   :  { %1138 = vmatprep.subr.mxu0 %v1401_v6 }
 0x3c3   :  { %1139 = vmatpush3.msra.mxu0 %v1492_v13 }
 0x3c4   :  { %1140 = vmatprep.subr.mxu0 %v1401_v6 }
 0x3c5   :  { %1141 = vmatpush3.msra.mxu0 %v1498_v14 }
 0x3c6   :  { %1142 = vmatprep.subr.mxu0 %v1401_v6 }
 0x3c7   :  { %1143 = vmatpush3.msra.mxu0 %v1505_v15 }
 0x3c8   :  { %1144 = vmatprep.subr.mxu0 %v1401_v6 }
 0x3c9   :  { %1145 = vmatpush3.msra.mxu0 %v1511_v16 }
 0x3ca   :  { %1146 = vmatprep.subr.mxu0 %v1401_v6 }
 0x3cb   :  { %1147 = vmatpush3.msra.mxu0 %v1517_v17 }
 0x3cc   :  { %1148 = vmatprep.subr.mxu0 %v1401_v6 }
 0x3cd   :  { %1149 = vmatpush3.msra.mxu0 %v1523_v18 }
 0x3ce   :  { %1150 = vmatprep.subr.mxu0 %v1401_v6 }
 0x3cf   :  { %1151 = vmatpush3.msra.mxu0 %v1529_v19 }
 0x3d0   :  { %1152 = vmatprep.subr.mxu0 %v1401_v6 }
 0x3d1   :  { %1153 = vmatpush3.msra.mxu0 %v1535_v20 }
 0x3d2   :  { %1154 = vmatprep.subr.mxu0 %v1401_v6 }
 0x3d3   :  { %1155 = vmatpush3.msra.mxu0 %v1541_v21 }
 0x3d4   :  { %1194 = vmatprep.subr.mxu0 %v1401_v6 }
 0x474   :  { %v347_v56 = vpop.f32.mrf.mxu0 }
 0x475   :  { %v351_v57 = vmax.f32 %v347_v56, 1e-30 }
 0x476   :  { %v1088_v58 = vpop.f32.mrf.mxu0 }
 0x477   :  { %1283 = vlog2.f32 %v351_v57 }
 0x484   :  { %v1284_v61 = vpop.eup %1283 }
 0x485   :  { %v355_v63 = vmul.f32 0.6931472, %v1284_v61 }
 0x487   :  { %v356_v0 = vadd.f32 %v355_v63, %v353_v62 }
 0x489   :  { %v360_v1 = vsel %vm841_vm4, %v356_v0, %v273_v51 }
 0x48a   :  { %363 = vmax.xlane.f32.xlu1 %v360_v1 }
 0x513   :  { %v364_v2 = vpop.xlane.xlu1 %363 }
 0x514   :  { %v365_v3 = vsub.f32 %v360_v1, %v364_v2  ;;  %v439_v27 = vadd.f32 %v364_v2, %v362_v26 }
 0x516   :  { %v366_v4 = vmul.f32 1.442695, %v365_v3  ;;  %v440_v29 = vadd.f32 %v1594_v31, %v439_v27  ;;  %v710_v3 = vld [vmem:[#allocation5 + $0x38] sm:$0xff] }
 0x518   :  { %1285 = vpow2.f32 %v366_v4 }
 0x525   :  { %v1286_v22 = vpop.eup %1285 }
 0x526   :  { %1122 = vmatmul.mubr.f32.vlgmr.msra.gmra.mxu1 %v1286_v22 }
 0x527   :  { %1160 = vmatpush3.msra.mxu1 %v1453_v5  ;;  %1191 = vmatprep.mubr.msk.f32.mxu1 %vm1402_vm1, %v1401_v6 }
 0x528   :  { %1161 = vmatprep.subr.mxu1 %v1401_v6 }
 0x529   :  { %1162 = vmatpush3.msra.mxu1 %v1457_v7 }
 0x52a   :  { %1163 = vmatprep.subr.mxu1 %v1401_v6 }
 0x52b   :  { %1164 = vmatpush3.msra.mxu1 %v1462_v8 }
 0x52c   :  { %1165 = vmatprep.subr.mxu1 %v1401_v6 }
 0x52d   :  { %1166 = vmatpush3.msra.mxu1 %v1468_v9 }
 0x52e   :  { %1167 = vmatprep.subr.mxu1 %v1401_v6 }
 0x52f   :  { %1168 = vmatpush3.msra.mxu1 %v1474_v10 }
 0x530   :  { %1169 = vmatprep.subr.mxu1 %v1401_v6 }
 0x531   :  { %1170 = vmatpush3.msra.mxu1 %v1480_v11 }
 0x532   :  { %1171 = vmatprep.subr.mxu1 %v1401_v6 }
 0x533   :  { %1172 = vmatpush3.msra.mxu1 %v1486_v12 }
 0x534   :  { %1173 = vmatprep.subr.mxu1 %v1401_v6 }
 0x535   :  { %1174 = vmatpush3.msra.mxu1 %v1492_v13 }
 0x536   :  { %1175 = vmatprep.subr.mxu1 %v1401_v6 }
 0x537   :  { %1176 = vmatpush3.msra.mxu1 %v1498_v14 }
 0x538   :  { %1177 = vmatprep.subr.mxu1 %v1401_v6 }
 0x539   :  { %1178 = vmatpush3.msra.mxu1 %v1505_v15 }
 0x53a   :  { %1179 = vmatprep.subr.mxu1 %v1401_v6 }
 0x53b   :  { %1180 = vmatpush3.msra.mxu1 %v1511_v16 }
 0x53c   :  { %1181 = vmatprep.subr.mxu1 %v1401_v6 }
 0x53d   :  { %1182 = vmatpush3.msra.mxu1 %v1517_v17 }
 0x53e   :  { %1183 = vmatprep.subr.mxu1 %v1401_v6 }
 0x53f   :  { %1184 = vmatpush3.msra.mxu1 %v1523_v18 }
 0x540   :  { %1185 = vmatprep.subr.mxu1 %v1401_v6 }
 0x541   :  { %1186 = vmatpush3.msra.mxu1 %v1529_v19 }
 0x542   :  { %1187 = vmatprep.subr.mxu1 %v1401_v6 }
 0x543   :  { %1188 = vmatpush3.msra.mxu1 %v1535_v20 }
 0x544   :  { %1189 = vmatprep.subr.mxu1 %v1401_v6 }
 0x545   :  { %1190 = vmatpush3.msra.mxu1 %v1541_v21 }
 0x546   :  { %1229 = vmatprep.subr.mxu1 %v1401_v6 }
 0x5e6   :  { %v434_v23 = vpop.f32.mrf.mxu1 }
 0x5e7   :  { %v438_v24 = vmax.f32 %v434_v23, 1e-30 }
 0x5e8   :  { %v1123_v25 = vpop.f32.mrf.mxu1 }
 0x5e9   :  { %1287 = vlog2.f32 %v438_v24 }
 0x5f6   :  { %v1288_v28 = vpop.eup %1287 }
 0x5f7   :  { %v442_v30 = vmul.f32 0.6931472, %v1288_v28 }
 0x5f9   :  { %v443_v33 = vadd.f32 %v442_v30, %v440_v29 }
 0x5fb   :  { %v447_v34 = vsel %vm842_vm5, %v443_v33, %v360_v1 }
 0x5fc   :  { %450 = vmax.xlane.f32.xlu0 %v447_v34 }
 0x685   :  { %v451_v35 = vpop.xlane.xlu0 %450 }
 0x686   :  { %v452_v36 = vsub.f32 %v447_v34, %v451_v35  ;;  %v526_v43 = vadd.f32 %v451_v35, %v449_v42 }
 0x688   :  { %v453_v37 = vmul.f32 1.442695, %v452_v36  ;;  %v527_v45 = vadd.f32 %v1594_v31, %v526_v43 }
 0x68a   :  { %1289 = vpow2.f32 %v453_v37 }
 0x697   :  { %v1290_v38 = vpop.eup %1289 }
 0x698   :  { %1157 = vmatmul.mubr.f32.vlgmr.msra.gmra.mxu0 %v1290_v38 }
 0x699   :  { %1195 = vmatpush3.msra.mxu0 %v1453_v5  ;;  %1226 = vmatprep.mubr.msk.f32.mxu0 %vm1402_vm1, %v1401_v6 }
 0x69a   :  { %1196 = vmatprep.subr.mxu0 %v1401_v6 }
 0x69b   :  { %1197 = vmatpush3.msra.mxu0 %v1457_v7 }
 0x69c   :  { %1198 = vmatprep.subr.mxu0 %v1401_v6 }
 0x69d   :  { %1199 = vmatpush3.msra.mxu0 %v1462_v8 }
 0x69e   :  { %1200 = vmatprep.subr.mxu0 %v1401_v6 }
 0x69f   :  { %1201 = vmatpush3.msra.mxu0 %v1468_v9 }
 0x6a0   :  { %1202 = vmatprep.subr.mxu0 %v1401_v6 }
 0x6a1   :  { %1203 = vmatpush3.msra.mxu0 %v1474_v10 }
 0x6a2   :  { %1204 = vmatprep.subr.mxu0 %v1401_v6 }
 0x6a3   :  { %1205 = vmatpush3.msra.mxu0 %v1480_v11 }
 0x6a4   :  { %1206 = vmatprep.subr.mxu0 %v1401_v6 }
 0x6a5   :  { %1207 = vmatpush3.msra.mxu0 %v1486_v12 }
 0x6a6   :  { %1208 = vmatprep.subr.mxu0 %v1401_v6 }
 0x6a7   :  { %1209 = vmatpush3.msra.mxu0 %v1492_v13 }
 0x6a8   :  { %1210 = vmatprep.subr.mxu0 %v1401_v6 }
 0x6a9   :  { %1211 = vmatpush3.msra.mxu0 %v1498_v14 }
 0x6aa   :  { %1212 = vmatprep.subr.mxu0 %v1401_v6 }
 0x6ab   :  { %1213 = vmatpush3.msra.mxu0 %v1505_v15 }
 0x6ac   :  { %1214 = vmatprep.subr.mxu0 %v1401_v6 }
 0x6ad   :  { %1215 = vmatpush3.msra.mxu0 %v1511_v16 }
 0x6ae   :  { %1216 = vmatprep.subr.mxu0 %v1401_v6 }
 0x6af   :  { %1217 = vmatpush3.msra.mxu0 %v1517_v17 }
 0x6b0   :  { %1218 = vmatprep.subr.mxu0 %v1401_v6 }
 0x6b1   :  { %1219 = vmatpush3.msra.mxu0 %v1523_v18 }
 0x6b2   :  { %1220 = vmatprep.subr.mxu0 %v1401_v6 }
 0x6b3   :  { %1221 = vmatpush3.msra.mxu0 %v1529_v19 }
 0x6b4   :  { %1222 = vmatprep.subr.mxu0 %v1401_v6 }
 0x6b5   :  { %1223 = vmatpush3.msra.mxu0 %v1535_v20 }
 0x6b6   :  { %1224 = vmatprep.subr.mxu0 %v1401_v6 }
 0x6b7   :  { %1225 = vmatpush3.msra.mxu0 %v1541_v21 }
 0x758   :  { %v521_v39 = vpop.f32.mrf.mxu0 }
 0x759   :  { %v525_v40 = vmax.f32 %v521_v39, 1e-30 }
 0x75a   :  { %v1158_v41 = vpop.f32.mrf.mxu0 }
 0x75b   :  { %1291 = vlog2.f32 %v525_v40 }
 0x768   :  { %v1292_v44 = vpop.eup %1291 }
 0x769   :  { %v529_v46 = vmul.f32 0.6931472, %v1292_v44 }
 0x76b   :  { %v530_v47 = vadd.f32 %v529_v46, %v527_v45 }
 0x76d   :  { %v534_v48 = vsel %vm843_vm6, %v530_v47, %v447_v34 }
 0x76e   :  { %537 = vmax.xlane.f32.xlu1 %v534_v48 }
 0x7f7   :  { %v538_v49 = vpop.xlane.xlu1 %537 }
 0x7f8   :  { %v539_v50 = vsub.f32 %v534_v48, %v538_v49 }
 0x7fa   :  { %v540_v51 = vmul.f32 1.442695, %v539_v50 }
 0x7fc   :  { %1293 = vpow2.f32 %v540_v51 }
 0x809   :  { %v1294_v52 = vpop.eup %1293 }
 0x80a   :  { %1192 = vmatmul.mubr.f32.vlgmr.msra.gmra.mxu1 %v1294_v52 }
 0x80b   :  { %1230 = vmatpush3.msra.mxu1 %v1453_v5  ;;  %1261 = vmatprep.mubr.msk.f32.mxu1 %vm1402_vm1, %v1401_v6 }
 0x80c   :  { %1231 = vmatprep.subr.mxu1 %v1401_v6 }
 0x80d   :  { %1232 = vmatpush3.msra.mxu1 %v1457_v7 }
 0x80e   :  { %1233 = vmatprep.subr.mxu1 %v1401_v6 }
 0x80f   :  { %1234 = vmatpush3.msra.mxu1 %v1462_v8 }
 0x810   :  { %1235 = vmatprep.subr.mxu1 %v1401_v6 }
 0x811   :  { %1236 = vmatpush3.msra.mxu1 %v1468_v9  ;;  %v536_v9 = vld [vmem:[#allocation5 + $0x28] sm:$0xff] }
 0x812   :  { %1237 = vmatprep.subr.mxu1 %v1401_v6 }
 0x813   :  { %1238 = vmatpush3.msra.mxu1 %v1474_v10  ;;  %v613_v10 = vadd.f32 %v538_v49, %v536_v9 }
 0x814   :  { %1239 = vmatprep.subr.mxu1 %v1401_v6 }
 0x815   :  { %1240 = vmatpush3.msra.mxu1 %v1480_v11 }
 0x816   :  { %1241 = vmatprep.subr.mxu1 %v1401_v6 }
 0x817   :  { %1242 = vmatpush3.msra.mxu1 %v1486_v12  ;;  %v614_v12 = vadd.f32 %v1594_v31, %v613_v10 }
 0x818   :  { %1243 = vmatprep.subr.mxu1 %v1401_v6 }
 0x819   :  { %1244 = vmatpush3.msra.mxu1 %v1492_v13 }
 0x81a   :  { %1245 = vmatprep.subr.mxu1 %v1401_v6 }
 0x81b   :  { %1246 = vmatpush3.msra.mxu1 %v1498_v14 }
 0x81c   :  { %1247 = vmatprep.subr.mxu1 %v1401_v6 }
 0x81d   :  { %1248 = vmatpush3.msra.mxu1 %v1505_v15 }
 0x81e   :  { %1249 = vmatprep.subr.mxu1 %v1401_v6 }
 0x81f   :  { %1250 = vmatpush3.msra.mxu1 %v1511_v16 }
 0x820   :  { %1251 = vmatprep.subr.mxu1 %v1401_v6 }
 0x821   :  { %1252 = vmatpush3.msra.mxu1 %v1517_v17 }
 0x822   :  { %1253 = vmatprep.subr.mxu1 %v1401_v6 }
 0x823   :  { %1254 = vmatpush3.msra.mxu1 %v1523_v18 }
 0x824   :  { %1255 = vmatprep.subr.mxu1 %v1401_v6 }
 0x825   :  { %1256 = vmatpush3.msra.mxu1 %v1529_v19 }
 0x826   :  { %1257 = vmatprep.subr.mxu1 %v1401_v6 }
 0x827   :  { %1258 = vmatpush3.msra.mxu1 %v1535_v20 }
 0x828   :  { %1259 = vmatprep.subr.mxu1 %v1401_v6 }
 0x829   :  { %1260 = vmatpush3.msra.mxu1 %v1541_v21 }
 0x8ca   :  { %v608_v5 = vpop.f32.mrf.mxu1 }
 0x8cb   :  { %v612_v7 = vmax.f32 %v608_v5, 1e-30 }
 0x8cc   :  { %v1193_v8 = vpop.f32.mrf.mxu1 }
 0x8cd   :  { %1295 = vlog2.f32 %v612_v7 }
 0x8da   :  { %v1296_v11 = vpop.eup %1295 }
 0x8db   :  { %v616_v13 = vmul.f32 0.6931472, %v1296_v11 }
 0x8dd   :  { %v617_v14 = vadd.f32 %v616_v13, %v614_v12 }
 0x8df   :  { %v621_v15 = vsel %vm844_vm7, %v617_v14, %v534_v48 }
 0x8e0   :  { %624 = vmax.xlane.f32.xlu0 %v621_v15 }
 0x969   :  { %v625_v16 = vpop.xlane.xlu0 %624 }
 0x96a   :  { %v626_v17 = vsub.f32 %v621_v15, %v625_v16  ;;  %v700_v54 = vadd.f32 %v625_v16, %v623_v53 }
 0x96c   :  { %v627_v6 = vmul.f32 1.442695, %v626_v17  ;;  %v701_v56 = vadd.f32 %v1594_v31, %v700_v54 }
 0x96e   :  { %1297 = vpow2.f32 %v627_v6 }
 0x97b   :  { %v1298_v18 = vpop.eup %1297 }
 0x97c   :  { %1227 = vmatmul.mubr.f32.vlgmr.msra.gmra.mxu0 %v1298_v18 }
 0xa3c   :  { %v695_v19 = vpop.f32.mrf.mxu0 }
 0xa3d   :  { %v699_v20 = vmax.f32 %v695_v19, 1e-30 }
 0xa3e   :  { %v1228_v21 = vpop.f32.mrf.mxu0 }
 0xa3f   :  { %1299 = vlog2.f32 %v699_v20 }
 0xa4c   :  { %v1300_v55 = vpop.eup %1299 }
 0xa4d   :  { %v703_v57 = vmul.f32 0.6931472, %v1300_v55 }
 0xa4f   :  { %v704_v58 = vadd.f32 %v703_v57, %v701_v56 }
 0xa51   :  { %v708_v59 = vsel %vm845_vm8, %v704_v58, %v621_v15 }
 0xa52   :  { %711 = vmax.xlane.f32.xlu1 %v708_v59 }
 0xadb   :  { %v712_v60 = vpop.xlane.xlu1 %711 }
 0xadc   :  { %v713_v61 = vsub.f32 %v708_v59, %v712_v60  ;;  %v787_v4 = vadd.f32 %v712_v60, %v710_v3 }
 0xade   :  { %v714_v62 = vmul.f32 1.442695, %v713_v61  ;;  %v788_v23 = vadd.f32 %v1594_v31, %v787_v4 }
 0xae0   :  { %1301 = vpow2.f32 %v714_v62 }
 0xaed   :  { %v1302_v63 = vpop.eup %1301 }
 0xaee   :  { %1262 = vmatmul.mubr.f32.vlgmr.msra.gmra.mxu1 %v1302_v63 }
 0xbae   :  { %v782_v0 = vpop.f32.mrf.mxu1 }
 0xbaf   :  { %v786_v1 = vmax.f32 %v782_v0, 1e-30 }
 0xbb0   :  { %v1263_v2 = vpop.f32.mrf.mxu1 }
 0xbb1   :  { %1303 = vlog2.f32 %v786_v1 }
 0xbbe   :  { %v1304_v22 = vpop.eup %1303 }
 0xbbf   :  { %v790_v24 = vmul.f32 0.6931472, %v1304_v22 }
 0xbc1   :  { %v791_v25 = vadd.f32 %v790_v24, %v788_v23 }
 0xbc3   :  { %v795_v26 = vsel %vm846_vm9, %v791_v25, %v708_v59 }
 0xbc4   :  { %796 = vst [vmem:[#allocation2] sm:$0xff] %v795_v26 }
 0xbc5 PF:  { %v847_v28 = vld [vmem:[#allocation10] ss:$0 sm:$0xff]  ;;  %s1403_s3 = smov [#allocation11]  }
 0xbc6   :  { %s826_s5 = sshll.u32 %s1403_s3, 4  ;;  %s827_s5 = int_to_ptr.vmem [resolvable:$true] %s826_s5 }
 0xbc7   :  { %s1369_s17 = scalar_lea.vmem %s827_s5, 128  ;;  %p1374_p3 = scmp.lt.s32.totalorder %s827_s5, %s827_s5 }
 0xbc8   :  { %p1370_p2 = scmp.ne.s32.totalorder %s827_s5, %s1369_s17  ;;  %p1375_p4 = scmp.lt.s32.totalorder %s1369_s17, %s1369_s17 }
 0xbca   :  { %p1376_p5 = por %p1375_p4, %p1374_p3 }
 0xbcb   :  { %v800_v27 = vld [vmem:[#allocation2] sm:$0xff] }
 0xbcc   :  { %v808_v29 = vadd.f32 %v847_v28, %v800_v27  ;;  %p1377_p6 = pnand %p1376_p5, %p1370_p2 }
 0xbce   :  { %809 = vmax.xlane.f32.xlu0 %v808_v29 }
 0xc57   :  { %v810_v30 = vpop.xlane.xlu0 %809 }
 0xc58   :  { %v811_v33 = vsub.f32 %v808_v29, %v810_v30 }
 0xc5a   :  { %v812_v34 = vmul.f32 1.442695, %v811_v33 }
 0xc5c   :  { %1305 = vpow2.f32 %v812_v34 }
 0xc69   :  { %v1306_v35 = vpop.eup %1305 }
 0xc6a   :  { %814 = vadd.xlane.f32.xlu0 %v1306_v35 }
 0xcf3   :  { %v815_v36 = vpop.xlane.xlu0 %814 }
 0xcf4   :  { %1307 = vlog2.f32 %v815_v36 }
 0xd01   :  { %v1308_v31 = vpop.eup %1307 }
 0xd02   :  { %v817_v32 = vmul.f32 0.6931472, %v1308_v31 }
 0xd04   :  { %v818_v37 = vadd.f32 %v817_v32, %v810_v30 }
 0xd06   :  { %819 = vst [vmem:[#allocation11] sm:$0xff] %v818_v37 }
 0xd07   :  { %1380 = shalt.err (!%p1377_p6)
}
 0xd08   :  { %829 = dma.vmem_to_hbm [thread:$0]  %s827_s5, 128, %s1795_s6, [#allocation7]  }
 0xd09   :  { %1393 = dma.done.wait [#allocation7], 128  }
 0xd0a   :  { %1394 = vsyncadd [#allocation7], 4294967168 }
 0xd0b   :  { %833 = vsyncpa [#allocation6], 1 }
 0xd0c   :  { %834 = vsyncpa [#allocation9], 1 }
 0xd0d   :  { %835 = vsyncpa [#allocation7], 1 }

</bundles_post_ra>
